<compile_context>
chip_gen: v5e
topology: v5e:2x2
jax: 0.10.0
libtpu: 0.0.40
codegen_flags: <defaults>
</compile_context>

<pallas_src>
import functools

import jax
import jax.numpy as jnp
from jax.experimental import pallas as pl
from jax.experimental.pallas import tpu as pltpu


def _focal_loss_kernel(logits_ref, targets_ref, alpha_ref, out_ref, *,
                       gamma, ignore_index):
    x = logits_ref[...].astype(jnp.float32)          # (TN, C)
    t = targets_ref[...]                             # (TN, 1) int32

    # Numerically stable log-softmax over the class (lane) axis.
    m = jnp.max(x, axis=-1, keepdims=True)
    z = x - m
    lse = jnp.log(jnp.sum(jnp.exp(z), axis=-1, keepdims=True))
    logp = z - lse                                    # (TN, C)

    # One-hot gather of the target log-prob (ignored targets never match -> 0).
    cls = jax.lax.broadcasted_iota(jnp.int32, x.shape, 1)
    onehot = (cls == t).astype(jnp.float32)           # (TN, C)
    valid = (t != ignore_index)                       # (TN, 1) bool

    tgt_logp = jnp.sum(logp * onehot, axis=-1, keepdims=True)   # (TN, 1), <= 0
    ce = jnp.where(valid, jnp.maximum(-tgt_logp, 0.0), 0.0)     # CE; 0 if ignored
    p_t = jnp.exp(tgt_logp)                           # == exp(-ce); 1 on ignored rows
    one_minus_pt = jnp.maximum(1.0 - p_t, 0.0)        # clamp: no pow(negative, gamma)

    # (1 - p_t) ** gamma : integer gamma -> repeated VPU multiplies (no EUP pow).
    if float(gamma) == int(gamma) and gamma >= 0:
        g = int(gamma)
        w = jnp.ones_like(one_minus_pt)
        base = one_minus_pt
        while g > 0:
            if g & 1:
                w = w * base
            g >>= 1
            if g:
                base = base * base
    else:
        w = one_minus_pt ** jnp.float32(gamma)

    # alpha_t = alpha[target]; ignored rows give 0 (they contribute 0 anyway).
    alpha_t = jnp.sum(alpha_ref[...].astype(jnp.float32) * onehot,
                      axis=-1, keepdims=True)         # (TN, 1)

    focal = alpha_t * w * ce                          # (TN, 1)

    # Independent per-grid-step partial sum, written as a lane-dense block.
    partial = jnp.sum(focal)
    out_ref[...] = jnp.broadcast_to(partial, out_ref.shape).astype(jnp.float32)


def _choose_block_n(n, c, itemsize, *, budget_bytes=8 << 20, max_block=2048):
    """Largest batch tile whose double-buffered logits slab fits the budget."""
    bn = budget_bytes // max(1, 2 * c * itemsize)
    bn = max(8, min(int(bn), max_block))
    bn = (bn // 8) * 8
    n_pad8 = -(-n // 8) * 8
    return max(8, min(bn, n_pad8))


def focal_loss(logits, targets, alpha=None, gamma=1.0, ignore_index=-100,
               reduction='mean', block_n=None):
    """Focal loss matching the PyTorch FocalLoss module's forward pass."""
    if reduction not in ('mean', 'sum'):
        # TODO(synk): reduction='none' (per-sample output) not implemented.
        raise NotImplementedError("reduction must be 'mean' or 'sum'")

    N, C = logits.shape
    if block_n is None:
        block_n = _choose_block_n(N, C, jnp.dtype(logits.dtype).itemsize)

    # Pad the batch to a multiple of block_n with ignored rows (contribute 0).
    n_pad = -(-N // block_n) * block_n
    if n_pad != N:
        logits = jnp.pad(logits, ((0, n_pad - N), (0, 0)))
        targets = jnp.pad(targets, (0, n_pad - N), constant_values=ignore_index)
    num_blocks = n_pad // block_n

    if alpha is None:
        alpha_arr = jnp.ones((C,), jnp.float32)       # alpha_t == 1.0
    else:
        alpha_arr = jnp.asarray(alpha, jnp.float32)
    alpha2d = alpha_arr.reshape(1, C)
    targets2d = targets.astype(jnp.int32).reshape(n_pad, 1)

    kernel = functools.partial(_focal_loss_kernel, gamma=float(gamma),
                               ignore_index=int(ignore_index))

    partials = pl.pallas_call(
        kernel,
        out_shape=jax.ShapeDtypeStruct((num_blocks, 8, 128), jnp.float32),
        grid_spec=pltpu.PrefetchScalarGridSpec(
            num_scalar_prefetch=0,
            grid=(num_blocks,),
            in_specs=[
                pl.BlockSpec((block_n, C), lambda i: (i, 0)),   # logits tile
                pl.BlockSpec((block_n, 1), lambda i: (i, 0)),   # targets tile
                pl.BlockSpec((1, C), lambda i: (0, 0)),         # alpha (resident)
            ],
            out_specs=pl.BlockSpec((1, 8, 128), lambda i: (i, 0, 0)),
        ),
        compiler_params=pltpu.CompilerParams(
            dimension_semantics=("parallel",),   # independent partials -> 2 TCs on v7x
            vmem_limit_bytes=32 * 1024 * 1024),
    )(logits, targets2d, alpha2d)

    total = jnp.sum(partials[:, 0, 0])
    if reduction == 'sum':
        return total
    # reduction='mean': mean over ALL N samples (matches torch focal_loss.mean()).
    return total / jnp.float32(N)


def _focal_loss_ref(logits, targets, alpha, gamma, ignore_index=-100):
    """Plain-JAX reference mirroring torch CrossEntropyLoss(reduction='none')."""
    logp = jax.nn.log_softmax(logits.astype(jnp.float32), axis=-1)
    valid = targets != ignore_index
    safe_t = jnp.where(valid, targets, 0)
    tgt_logp = jnp.take_along_axis(logp, safe_t[:, None], axis=-1)[:, 0]
    ce = jnp.where(valid, -tgt_logp, 0.0)
    p_t = jnp.exp(-ce)
    if alpha is None:
        alpha_t = 1.0
    else:
        alpha_t = jnp.where(valid, jnp.asarray(alpha, jnp.float32)[safe_t], 0.0)
    focal = alpha_t * (1.0 - p_t) ** gamma * ce
    return jnp.mean(focal)


if __name__ == "__main__":
    key = jax.random.PRNGKey(0)
    k1, k2, k3 = jax.random.split(key, 3)
    ignore_index = -100

    # Case 1: per-class alpha, integer gamma, a few ignored rows.
    N, C = 64, 16
    gamma = 2.0
    logits = jax.random.normal(k1, (N, C), dtype=jnp.float32)
    targets = jax.random.randint(k2, (N,), 0, C, dtype=jnp.int32)
    targets = targets.at[3].set(ignore_index).at[17].set(ignore_index)
    alpha = 0.5 + 0.05 * jnp.arange(C, dtype=jnp.float32)

    loss = jax.block_until_ready(
        focal_loss(logits, targets, alpha=alpha, gamma=gamma,
                   ignore_index=ignore_index))
    ref = _focal_loss_ref(logits, targets, alpha, gamma, ignore_index)
    assert jnp.allclose(loss, ref, rtol=1e-4, atol=1e-6), (loss, ref)

    # Case 2: no alpha, non-integer gamma, batch not a multiple of the tile
    # (exercises the padding path and the pow fallback).
    N2, C2 = 61, 16
    gamma2 = 1.5
    logits2 = jax.random.normal(k3, (N2, C2), dtype=jnp.float32)
    targets2 = jax.random.randint(k2, (N2,), 0, C2, dtype=jnp.int32)
    targets2 = targets2.at[0].set(ignore_index)

    loss2 = jax.block_until_ready(
        focal_loss(logits2, targets2, alpha=None, gamma=gamma2,
                   ignore_index=ignore_index))
    ref2 = _focal_loss_ref(logits2, targets2, None, gamma2, ignore_index)
    assert jnp.allclose(loss2, ref2, rtol=1e-4, atol=1e-6), (loss2, ref2)

    print("KERNEL_OK")
</pallas_src>

<mosaic_0001>
module attributes {stable_mosaic.version = 11 : i64} {
  func.func @_focal_loss_kernel(%arg0: i32, %arg1: memref<64x16xf32, #tpu.memory_space<vmem>>, %arg2: memref<64x1xi32, #tpu.memory_space<vmem>>, %arg3: memref<1x16xf32, #tpu.memory_space<vmem>>, %arg4: memref<1x8x128xf32, #tpu.memory_space<vmem>>) attributes {dimension_semantics = [#tpu.dimension_semantics<parallel>], iteration_bounds = array<i64: 1>, scalar_prefetch = 0 : i64, scratch_operands = 0 : i64, tpu.core_type = #tpu.core_type<tc>, window_params = [{transform_indices = @transform_0, window_bounds = array<i64: 64, 16>}, {transform_indices = @transform_1, window_bounds = array<i64: 64, 1>}, {pipeline_mode = #tpu.pipeline_mode<synchronous>, transform_indices = @transform_2, window_bounds = array<i64: 1, 16>}, {transform_indices = @transform_3, window_bounds = array<i64: 1, 8, 128>}]} {
    %c0 = arith.constant 0 : index
    %c0_0 = arith.constant 0 : index
    %0 = vector.load %arg1[%c0, %c0_0] : memref<64x16xf32, #tpu.memory_space<vmem>>, vector<64x16xf32>
    %c0_1 = arith.constant 0 : index
    %c0_2 = arith.constant 0 : index
    %1 = vector.load %arg2[%c0_1, %c0_2] : memref<64x1xi32, #tpu.memory_space<vmem>>, vector<64x1xi32>
    %cst = arith.constant dense<0xFF800000> : vector<64xf32>
    %2 = vector.multi_reduction <maximumf>, %0, %cst [1] : vector<64x16xf32> to vector<64xf32>
    %3 = vector.shape_cast %2 : vector<64xf32> to vector<64x1xf32>
    %4 = vector.broadcast %3 : vector<64x1xf32> to vector<64x16xf32>
    %5 = arith.subf %0, %4 : vector<64x16xf32>
    %6 = math.exp %5 : vector<64x16xf32>
    %cst_3 = arith.constant dense<0.000000e+00> : vector<64xf32>
    %7 = vector.multi_reduction <add>, %6, %cst_3 [1] : vector<64x16xf32> to vector<64xf32>
    %8 = vector.shape_cast %7 : vector<64xf32> to vector<64x1xf32>
    %9 = math.log %8 : vector<64x1xf32>
    %10 = vector.broadcast %9 : vector<64x1xf32> to vector<64x16xf32>
    %11 = arith.subf %5, %10 : vector<64x16xf32>
    %12 = tpu.iota {dimensions = array<i32: 1>} : vector<64x16xi32>
    %13 = vector.broadcast %1 : vector<64x1xi32> to vector<64x16xi32>
    %14 = arith.cmpi eq, %12, %13 : vector<64x16xi32>
    %15 = arith.extui %14 : vector<64x16xi1> to vector<64x16xi32>
    %16 = arith.sitofp %15 : vector<64x16xi32> to vector<64x16xf32>
    %c-100_i32 = arith.constant -100 : i32
    %17 = vector.broadcast %c-100_i32 : i32 to vector<64x1xi32>
    %18 = arith.cmpi ne, %1, %17 : vector<64x1xi32>
    %19 = arith.mulf %11, %16 : vector<64x16xf32>
    %cst_4 = arith.constant dense<0.000000e+00> : vector<64xf32>
    %20 = vector.multi_reduction <add>, %19, %cst_4 [1] : vector<64x16xf32> to vector<64xf32>
    %21 = vector.shape_cast %20 : vector<64xf32> to vector<64x1xf32>
    %cst_5 = arith.constant 0.000000e+00 : f32
    %22 = vector.broadcast %cst_5 : f32 to vector<64x1xf32>
    %23 = arith.subf %22, %21 : vector<64x1xf32>
    %cst_6 = arith.constant 0.000000e+00 : f32
    %24 = vector.broadcast %cst_6 : f32 to vector<64x1xf32>
    %25 = arith.maximumf %23, %24 : vector<64x1xf32>
    %cst_7 = arith.constant 0.000000e+00 : f32
    %26 = vector.broadcast %cst_7 : f32 to vector<64x1xf32>
    %27 = arith.select %18, %25, %26 : vector<64x1xi1>, vector<64x1xf32>
    %28 = math.exp %21 : vector<64x1xf32>
    %cst_8 = arith.constant 1.000000e+00 : f32
    %29 = vector.broadcast %cst_8 : f32 to vector<64x1xf32>
    %30 = arith.subf %29, %28 : vector<64x1xf32>
    %cst_9 = arith.constant 0.000000e+00 : f32
    %31 = vector.broadcast %cst_9 : f32 to vector<64x1xf32>
    %32 = arith.maximumf %30, %31 : vector<64x1xf32>
    %cst_10 = arith.constant 1.000000e+00 : f32
    %33 = vector.broadcast %cst_10 : f32 to vector<64x1xf32>
    %34 = arith.mulf %32, %32 : vector<64x1xf32>
    %35 = arith.mulf %33, %34 : vector<64x1xf32>
    %c0_11 = arith.constant 0 : index
    %c0_12 = arith.constant 0 : index
    %36 = vector.load %arg3[%c0_11, %c0_12] : memref<1x16xf32, #tpu.memory_space<vmem>>, vector<1x16xf32>
    %37 = vector.broadcast %36 : vector<1x16xf32> to vector<64x16xf32>
    %38 = arith.mulf %37, %16 : vector<64x16xf32>
    %cst_13 = arith.constant dense<0.000000e+00> : vector<64xf32>
    %39 = vector.multi_reduction <add>, %38, %cst_13 [1] : vector<64x16xf32> to vector<64xf32>
    %40 = vector.shape_cast %39 : vector<64xf32> to vector<64x1xf32>
    %41 = arith.mulf %40, %35 : vector<64x1xf32>
    %42 = arith.mulf %41, %27 : vector<64x1xf32>
    %43 = vector.shape_cast %42 : vector<64x1xf32> to vector<1x64x1xf32>
    %cst_14 = arith.constant dense<0.000000e+00> : vector<1xf32>
    %44 = vector.multi_reduction <add>, %43, %cst_14 [1, 2] : vector<1x64x1xf32> to vector<1xf32>
    %45 = vector.shape_cast %44 : vector<1xf32> to vector<1x1x1xf32>
    %46 = vector.extract %45[0, 0, 0] : f32 from vector<1x1x1xf32>
    %47 = vector.broadcast %46 : f32 to vector<1x8x128xf32>
    %c0_15 = arith.constant 0 : index
    %c0_16 = arith.constant 0 : index
    %c0_17 = arith.constant 0 : index
    %48 = vector.load %arg4[%c0_15, %c0_16, %c0_17] : memref<1x8x128xf32, #tpu.memory_space<vmem>>, vector<1x8x128xf32>
    tpu.vector_store %arg4[%c0_15, %c0_16, %c0_17], %47 {strides = array<i32>} : memref<1x8x128xf32, #tpu.memory_space<vmem>>, vector<1x8x128xf32>,
    return
  }
  func.func @transform_0(%arg0: i32) -> (i32, i32) {
    %c0_i32 = arith.constant 0 : i32
    %c0_i32_0 = arith.constant 0 : i32
    return %arg0, %c0_i32 : i32, i32
  }
  func.func @transform_1(%arg0: i32) -> (i32, i32) {
    %c0_i32 = arith.constant 0 : i32
    %c0_i32_0 = arith.constant 0 : i32
    return %arg0, %c0_i32 : i32, i32
  }
  func.func @transform_2(%arg0: i32) -> (i32, i32) {
    %c0_i32 = arith.constant 0 : i32
    %c0_i32_0 = arith.constant 0 : i32
    %c0_i32_1 = arith.constant 0 : i32
    return %c0_i32, %c0_i32_0 : i32, i32
  }
  func.func @transform_3(%arg0: i32) -> (i32, i32, i32) {
    %c0_i32 = arith.constant 0 : i32
    %c0_i32_0 = arith.constant 0 : i32
    %c0_i32_1 = arith.constant 0 : i32
    return %arg0, %c0_i32, %c0_i32_0 : i32, i32, i32
  }
}

</mosaic_0001>

<bundles_post_ra>
// kernel: tpu_custom_call.1
= control target key start
LH: loop header
LB: loop body
LE: loop exit
PB: predicated region body
PF: predicated region fallthrough
CT: control target
= control target key end

     0   :  { %vm31_vm0 = vcmask 130048   ;;  %v468_v6 = vmov 0   ;;  %s701_s0 = inlined_call_operand.vmem [shape: f32[64,16], index: 0, kind: input, shape index: {}]   ;;  %s702_s1 = inlined_call_operand.vmem [shape: s32[64,1], index: 1, kind: input, shape index: {}]   ;;  %s703_s2 = inlined_call_operand.vmem [shape: f32[1,16], index: 2, kind: input, shape index: {}]   ;;  %s704_s3 = inlined_call_operand.hbm [shape: f32[1,8,128], index: 3, kind: output, shape index: {}]  }
   0x1   :  { %v19_v0 = vld [vmem:[%s701_s0 + $0x20] sm:$0xff]  ;;  %v17_v1 = vld [vmem:[%s701_s0 + $0x10] sm:$0xff]  ;;  %391 = vset.pattern.permute.xlu1 %v468_v6  ;;  %392 = vset.pattern.permute.xlu2 %v468_v6  ;;  %v20_v7 = vld [vmem:[%s701_s0 + $0x28] sm:$0xff] }
   0x2   :  { %v15_v2 = vld [vmem:[%s701_s0] sm:$0xff]  ;;  %v44_v3 = vsel %vm31_vm0, %v19_v0, -inf  ;;  %v38_v4 = vsel %vm31_vm0, %v17_v1, -inf  ;;  %v18_v8 = vld [vmem:[%s701_s0 + $0x18] sm:$0xff]  ;;  %390 = vset.pattern.permute.xlu0 %v468_v6 }
   0x3   :  { %v32_v5 = vsel %vm31_vm0, %v15_v2, -inf  ;;  %45 = vmax.xlane.f32.xlu2 %v44_v3  ;;  %39 = vmax.xlane.f32.xlu1 %v38_v4 }
   0x4   :  { %33 = vmax.xlane.f32.xlu0 %v32_v5 }
   0x5   :  { %8 = vsyncpa [#allocation3], 0  ;;  %v16_v9 = vld [vmem:[%s701_s0 + $0x8] sm:$0xff]  ;;  %v47_v10 = vsel %vm31_vm0, %v20_v7, -inf  ;;  %v41_v11 = vsel %vm31_vm0, %v18_v8, -inf  ;;  %v22_v13 = vld [vmem:[%s701_s0 + $0x38] sm:$0xff]  ;;  %v128_v5 = vlaneseq }
   0x6   :  { %v35_v12 = vsel %vm31_vm0, %v16_v9, -inf  ;;  %v21_v14 = vld [vmem:[%s701_s0 + $0x30] sm:$0xff]  ;;  %v53_v15 = vsel %vm31_vm0, %v22_v13, -inf  ;;  %v532_v18 = vld [vmem:[%s702_s1] sm:$0xff]  ;;  %v543_v20 = vld [vmem:[%s702_s1 + $0x8] sm:$0xff]  ;;  %vm334_vm13 = vcmask 7168  }
   0x7   :  { %v50_v16 = vsel %vm31_vm0, %v21_v14, -inf  ;;  %v526_v17 = vld [vmem:[%s702_s1 + $0x10] sm:$0xff]  ;;  %v537_v19 = vld [vmem:[%s702_s1 + $0x20] sm:$0xff]  ;;  %v550_v21 = vld [vmem:[%s702_s1 + $0x18] sm:$0xff]  ;;  %vm179_vm9 = vcmp.ne.s32.totalorder %v543_v20, 4294967196  ;;  %vm178_vm10 = vcmp.ne.s32.totalorder %v532_v18, 4294967196 }
   0x8   :  { %v588_v62 = vld [vmem:[%s702_s1 + $0x28] sm:$0xff]  ;;  %v594_v63 = vld [vmem:[%s702_s1 + $0x30] sm:$0xff]  ;;  %vm180_vm11 = vcmp.ne.s32.totalorder %v526_v17, 4294967196  ;;  %vm181_vm12 = vcmp.ne.s32.totalorder %v550_v21, 4294967196  ;;  %vm182_vm14 = vcmp.ne.s32.totalorder %v537_v19, 4294967196  ;;  %s368_s20 = sshll.u32 %s704_s3, 4  ;;  %s369_s20 = int_to_ptr.hbm [resolvable:$true] %s368_s20 }
   0x9   :  { %vm183_vm15 = vcmp.ne.s32.totalorder %v588_v62, 4294967196 }
   0xb   :  { %48 = vmax.xlane.f32.xlu2 %v47_v10  ;;  %42 = vmax.xlane.f32.xlu1 %v41_v11 }
   0xc   :  { %36 = vmax.xlane.f32.xlu0 %v35_v12 }
  0x13   :  { %54 = vmax.xlane.f32.xlu1 %v53_v15 }
  0x14   :  { %51 = vmax.xlane.f32.xlu0 %v50_v16 }
  0x23   :  { %137 = vperm.xlu2 %392, %v526_v17  }
  0x28   :  { %131 = vperm.xlu0 %390, %v532_v18  }
  0x2b   :  { %143 = vperm.xlu2 %392, %v537_v19  }
  0x2c   :  { %134 = vperm.xlu1 %391, %v543_v20  }
  0x34   :  { %140 = vperm.xlu1 %391, %v550_v21  }
  0x76   :  { %v46_v22 = vpop.xlane.xlu2 %45  ;;  %v40_v23 = vpop.xlane.xlu1 %39 }
  0x77   :  { %v553_v24 = vsub.f32 %v17_v1, %v40_v23  ;;  %v34_v25 = vpop.xlane.xlu0 %33  ;;  %v568_v40 = vsub.f32 %v19_v0, %v46_v22  ;;  %v600_v0 = vld [vmem:[%s702_s1 + $0x38] sm:$0xff]  ;;  %v469_v22 = vmov 0.0  }
  0x78   :  { %v555_v26 = vsub.f32 %v15_v2, %v34_v25 }
  0x79   :  { %v68_v27 = vmul.f32 1.442695, %v553_v24  ;;  %v72_v44 = vmul.f32 1.442695, %v568_v40 }
  0x7a   :  { %v64_v28 = vmul.f32 1.442695, %v555_v26 }
  0x7b   :  { %394 = vpow2.f32 %v68_v27 }
  0x7c   :  { %396 = vpow2.f32 %v64_v28 }
  0x7e   :  { %v49_v29 = vpop.xlane.xlu2 %48  ;;  %v43_v30 = vpop.xlane.xlu1 %42 }
  0x7f   :  { %v559_v31 = vsub.f32 %v20_v7, %v49_v29  ;;  %v561_v32 = vsub.f32 %v18_v8, %v43_v30  ;;  %v37_v33 = vpop.xlane.xlu0 %36 }
  0x80   :  { %v563_v34 = vsub.f32 %v16_v9, %v37_v33  ;;  %v603_v9 = vand.u32 127, %v128_v5 }
  0x81   :  { %v74_v35 = vmul.f32 1.442695, %v559_v31  ;;  %v70_v36 = vmul.f32 1.442695, %v561_v32  ;;  %v395_v37 = vpop.eup %394 }
  0x82   :  { %v66_v38 = vmul.f32 1.442695, %v563_v34  ;;  %v397_v39 = vpop.eup %396  ;;  %v86_v41 = vsel %vm31_vm0, %v395_v37, 0.0 }
  0x83   :  { %398 = vpow2.f32 %v74_v35  ;;  %87 = vadd.xlane.f32.xlu1 %v86_v41  ;;  %v80_v42 = vsel %vm31_vm0, %v397_v39, 0.0 }
  0x84   :  { %400 = vpow2.f32 %v70_v36  ;;  %81 = vadd.xlane.f32.xlu2 %v80_v42 }
  0x85   :  { %402 = vpow2.f32 %v66_v38 }
  0x86   :  { %v55_v43 = vpop.xlane.xlu1 %54  ;;  %404 = vpow2.f32 %v72_v44  ;;  %v138_v2 = vpop.permute.xlu2 %137 }
  0x87   :  { %v52_v45 = vpop.xlane.xlu0 %51  ;;  %v575_v48 = vsub.f32 %v22_v13, %v55_v43  ;;  %vm156_vm1 = vcmp.eq.s32.totalorder %v603_v9, %v138_v2 }
  0x88   :  { %v573_v46 = vsub.f32 %v21_v14, %v52_v45  ;;  %v609_v23 = vsel %vm156_vm1, 1.0, %v469_v22  ;;  %vm185_vm1 = vcmp.ne.s32.totalorder %v600_v0, 4294967196 }
  0x89   :  { %v399_v47 = vpop.eup %398  ;;  %v78_v55 = vmul.f32 1.442695, %v575_v48 }
  0x8a   :  { %v401_v49 = vpop.eup %400  ;;  %v76_v50 = vmul.f32 1.442695, %v573_v46  ;;  %v95_v51 = vsel %vm31_vm0, %v399_v47, 0.0 }
  0x8b   :  { %v403_v52 = vpop.eup %402  ;;  %v89_v53 = vsel %vm31_vm0, %v401_v49, 0.0  ;;  %96 = vadd.xlane.f32.xlu1 %v95_v51 }
  0x8c   :  { %406 = vpow2.f32 %v76_v50  ;;  %v83_v54 = vsel %vm31_vm0, %v403_v52, 0.0  ;;  %90 = vadd.xlane.f32.xlu2 %v89_v53  ;;  %v405_v56 = vpop.eup %404 }
  0x8d   :  { %84 = vadd.xlane.f32.xlu0 %v83_v54  ;;  %408 = vpow2.f32 %v78_v55  ;;  %v92_v59 = vsel %vm31_vm0, %v405_v56, 0.0 }
  0x8e   :  { %v144_v4 = vpop.permute.xlu2 %143 }
  0x8f   :  { %vm158_vm5 = vcmp.eq.s32.totalorder %v603_v9, %v144_v4 }
  0x90   :  { %v381_v54 = vsel %vm158_vm5, 1.0, %v469_v22 }
  0x92   :  { %v407_v57 = vpop.eup %406 }
  0x93   :  { %v98_v58 = vsel %vm31_vm0, %v407_v57, 0.0  ;;  %v409_v60 = vpop.eup %408 }
  0x94   :  { %99 = vadd.xlane.f32.xlu2 %v98_v58  ;;  %v101_v61 = vsel %vm31_vm0, %v409_v60, 0.0 }
  0x95   :  { %93 = vadd.xlane.f32.xlu0 %v92_v59 }
  0x9a   :  { %v132_v7 = vpop.permute.xlu0 %131 }
  0x9b   :  { %vm154_vm2 = vcmp.eq.s32.totalorder %v603_v9, %v132_v7 }
  0x9c   :  { %102 = vadd.xlane.f32.xlu2 %v101_v61  ;;  %v613_v27 = vsel %vm154_vm2, 1.0, %v469_v22 }
  0x9e   :  { %v135_v1 = vpop.permute.xlu1 %134 }
  0x9f   :  { %vm155_vm4 = vcmp.eq.s32.totalorder %v603_v9, %v135_v1 }
  0xa0   :  { %v378_v44 = vsel %vm155_vm4, 1.0, %v469_v22 }
  0xa4   :  { %146 = vperm.xlu1 %391, %v588_v62  }
  0xa6   :  { %v141_v3 = vpop.permute.xlu1 %140 }
  0xa7   :  { %vm157_vm3 = vcmp.eq.s32.totalorder %v603_v9, %v141_v3 }
  0xa8   :  { %v380_v42 = vsel %vm157_vm3, 1.0, %v469_v22 }
  0xa9   :  { %149 = vperm.xlu0 %390, %v594_v63  }
  0xb4   :  { %152 = vperm.xlu2 %392, %v600_v0  }
  0xf6   :  { %v88_v6 = vpop.xlane.xlu1 %87 }
  0xf7   :  { %410 = vlog2.f32 %v88_v6  ;;  %v82_v8 = vpop.xlane.xlu2 %81 }
  0xf8   :  { %412 = vlog2.f32 %v82_v8 }
  0xfd   :  { %v411_v10 = vpop.eup %410 }
  0xfe   :  { %v413_v11 = vpop.eup %412  ;;  %v109_v12 = vmul.f32 0.6931472, %v411_v10  ;;  %v97_v35 = vpop.xlane.xlu1 %96 }
  0xff   :  { %v105_v13 = vmul.f32 0.6931472, %v413_v11  ;;  %v91_v14 = vpop.xlane.xlu2 %90 }
 0x100   :  { %v85_v15 = vpop.xlane.xlu0 %84  ;;  %v122_v16 = vsub.f32 %v553_v24, %v109_v12  ;;  %414 = vlog2.f32 %v91_v14 }
 0x101   :  { %v120_v25 = vsub.f32 %v555_v26, %v105_v13  ;;  %416 = vlog2.f32 %v85_v15 }
 0x102   :  { %v188_v28 = vmul.f32 %v609_v23, %v122_v16 }
 0x103   :  { %v186_v29 = vmul.f32 %v613_v27, %v120_v25 }
 0x104   :  { %v200_v30 = vsel %vm31_vm0, %v188_v28, 0.0 }
 0x105   :  { %201 = vadd.xlane.f32.xlu2 %v200_v30  ;;  %v194_v24 = vsel %vm31_vm0, %v186_v29, 0.0 }
 0x106   :  { %v415_v33 = vpop.eup %414  ;;  %195 = vadd.xlane.f32.xlu1 %v194_v24 }
 0x107   :  { %v417_v36 = vpop.eup %416  ;;  %v111_v26 = vmul.f32 0.6931472, %v415_v33  ;;  %v100_v37 = vpop.xlane.xlu2 %99 }
 0x108   :  { %v94_v38 = vpop.xlane.xlu0 %93  ;;  %v107_v39 = vmul.f32 0.6931472, %v417_v36 }
 0x109   :  { %v123_v41 = vsub.f32 %v561_v32, %v111_v26  ;;  %418 = vlog2.f32 %v94_v38 }
 0x10a   :  { %420 = vlog2.f32 %v97_v35  ;;  %v121_v43 = vsub.f32 %v563_v34, %v107_v39 }
 0x10b   :  { %v189_v45 = vmul.f32 %v380_v42, %v123_v41  ;;  %422 = vlog2.f32 %v100_v37 }
 0x10c   :  { %v187_v47 = vmul.f32 %v378_v44, %v121_v43 }
 0x10d   :  { %v203_v49 = vsel %vm31_vm0, %v189_v45, 0.0 }
 0x10e   :  { %204 = vadd.xlane.f32.xlu1 %v203_v49  ;;  %v197_v50 = vsel %vm31_vm0, %v187_v47, 0.0 }
 0x10f   :  { %v419_v51 = vpop.eup %418  ;;  %198 = vadd.xlane.f32.xlu0 %v197_v50  ;;  %v103_v52 = vpop.xlane.xlu2 %102 }
 0x110   :  { %v421_v32 = vpop.eup %420  ;;  %v113_v53 = vmul.f32 0.6931472, %v419_v51  ;;  %424 = vlog2.f32 %v103_v52 }
 0x111   :  { %v115_v55 = vmul.f32 0.6931472, %v421_v32  ;;  %v423_v56 = vpop.eup %422 }
 0x112   :  { %v124_v34 = vsub.f32 %v568_v40, %v113_v53  ;;  %v117_v1 = vmul.f32 0.6931472, %v423_v56 }
 0x113   :  { %v125_v61 = vsub.f32 %v559_v31, %v115_v55 }
 0x114   :  { %v190_v57 = vmul.f32 %v381_v54, %v124_v34  ;;  %v126_v8 = vsub.f32 %v573_v46, %v117_v1 }
 0x116   :  { %v425_v58 = vpop.eup %424  ;;  %v206_v59 = vsel %vm31_vm0, %v190_v57, 0.0  ;;  %v147_v60 = vpop.permute.xlu1 %146 }
 0x117   :  { %v119_v2 = vmul.f32 0.6931472, %v425_v58  ;;  %207 = vadd.xlane.f32.xlu2 %v206_v59  ;;  %vm159_vm6 = vcmp.eq.s32.totalorder %v603_v9, %v147_v60  ;;  %v153_v3 = vpop.permute.xlu2 %152 }
 0x118   :  { %v382_v4 = vsel %vm159_vm6, 1.0, %v469_v22  ;;  %vm161_vm7 = vcmp.eq.s32.totalorder %v603_v9, %v153_v3 }
 0x119   :  { %v127_v40 = vsub.f32 %v575_v48, %v119_v2  ;;  %v384_v5 = vsel %vm161_vm7, 1.0, %v469_v22  ;;  %v191_v6 = vmul.f32 %v382_v4, %v125_v61  ;;  %v393_v48 = vld [vmem:[%s703_s2] ss:$0 sm:$0xff]  ;;  %s470_s2 = smov [#allocation2]  }
 0x11a   :  { %v286_v46 = vmul.f32 %v393_v48, %v613_v27  ;;  %v287_v16 = vmul.f32 %v393_v48, %v378_v44  ;;  %v289_v28 = vmul.f32 %v393_v48, %v380_v42  ;;  %v291_v29 = vmul.f32 %v393_v48, %v382_v4  ;;  %s366_s17 = sshll.u32 %s470_s2, 4  ;;  %s367_s17 = int_to_ptr.vmem [resolvable:$true] %s366_s17 }
 0x11b   :  { %v150_v7 = vpop.permute.xlu0 %149  ;;  %v209_v31 = vsel %vm31_vm0, %v191_v6, 0.0  ;;  %v193_v10 = vmul.f32 %v384_v5, %v127_v40  ;;  %v290_v24 = vmul.f32 %v393_v48, %v381_v54  ;;  %v293_v36 = vmul.f32 %v393_v48, %v384_v5 }
 0x11c   :  { %vm160_vm8 = vcmp.eq.s32.totalorder %v603_v9, %v150_v7  ;;  %210 = vadd.xlane.f32.xlu0 %v209_v31  ;;  %v288_v9 = vmul.f32 %v393_v48, %v609_v23  ;;  %v294_v15 = vsel %vm31_vm0, %v286_v46, 0.0  ;;  %v297_v25 = vsel %vm31_vm0, %v287_v16, 0.0 }
 0x11d   :  { %v383_v11 = vsel %vm160_vm8, 1.0, %v469_v22  ;;  %v215_v12 = vsel %vm31_vm0, %v193_v10, 0.0  ;;  %v303_v30 = vsel %vm31_vm0, %v289_v28, 0.0  ;;  %v309_v27 = vsel %vm31_vm0, %v291_v29, 0.0 }
 0x11e   :  { %v192_v13 = vmul.f32 %v383_v11, %v126_v8  ;;  %v300_v22 = vsel %vm31_vm0, %v288_v9, 0.0  ;;  %v306_v23 = vsel %vm31_vm0, %v290_v24, 0.0  ;;  %v292_v33 = vmul.f32 %v393_v48, %v383_v11 }
 0x11f   :  { %216 = vadd.xlane.f32.xlu2 %v215_v12  ;;  %v315_v26 = vsel %vm31_vm0, %v293_v36, 0.0 }
 0x120   :  { %v212_v14 = vsel %vm31_vm0, %v192_v13, 0.0  ;;  %v312_v35 = vsel %vm31_vm0, %v292_v33, 0.0  ;;  %vm184_vm0 = vcmp.ne.s32.totalorder %v594_v63, 4294967196 }
 0x121   :  { %213 = vadd.xlane.f32.xlu1 %v212_v14 }
 0x124   :  { %295 = vadd.xlane.f32.xlu0 %v294_v15 }
 0x127   :  { %301 = vadd.xlane.f32.xlu2 %v300_v22 }
 0x129   :  { %298 = vadd.xlane.f32.xlu1 %v297_v25 }
 0x12c   :  { %304 = vadd.xlane.f32.xlu0 %v303_v30 }
 0x12f   :  { %310 = vadd.xlane.f32.xlu2 %v309_v27 }
 0x131   :  { %307 = vadd.xlane.f32.xlu1 %v306_v23 }
 0x134   :  { %313 = vadd.xlane.f32.xlu0 %v312_v35 }
 0x139   :  { %316 = vadd.xlane.f32.xlu1 %v315_v26 }
 0x178   :  { %v202_v38 = vpop.xlane.xlu2 %201 }
 0x179   :  { %v196_v37 = vpop.xlane.xlu1 %195  ;;  %v246_v42 = vmul.f32 1.442695, %v202_v38  ;;  %v220_v61 = vsub.f32 0.0, %v202_v38 }
 0x17a   :  { %v242_v39 = vmul.f32 1.442695, %v196_v37  ;;  %v218_v59 = vsub.f32 0.0, %v196_v37 }
 0x17b   :  { %v228_v12 = vmax.f32 %v220_v61, 0.0 }
 0x17c   :  { %426 = vpow2.f32 %v242_v39  ;;  %v226_v8 = vmax.f32 %v218_v59, 0.0 }
 0x17d   :  { %428 = vpow2.f32 %v246_v42  ;;  %v236_v35 = vsel %vm180_vm11, %v228_v12, 0.0 }
 0x17e   :  { %v234_v29 = vsel %vm178_vm10, %v226_v8, 0.0 }
 0x181   :  { %v205_v44 = vpop.xlane.xlu1 %204 }
 0x182   :  { %v199_v41 = vpop.xlane.xlu0 %198  ;;  %v248_v45 = vmul.f32 1.442695, %v205_v44  ;;  %v427_v49 = vpop.eup %426  ;;  %v221_v31 = vsub.f32 0.0, %v205_v44 }
 0x183   :  { %v244_v43 = vmul.f32 1.442695, %v199_v41  ;;  %v429_v51 = vpop.eup %428  ;;  %v258_v52 = vsub.f32 1.0, %v427_v49  ;;  %v219_v1 = vsub.f32 0.0, %v199_v41 }
 0x184   :  { %v260_v54 = vsub.f32 1.0, %v429_v51  ;;  %v229_v25 = vmax.f32 %v221_v31, 0.0 }
 0x185   :  { %430 = vpow2.f32 %v244_v43  ;;  %v266_v56 = vmax.f32 %v258_v52, 0.0  ;;  %v227_v13 = vmax.f32 %v219_v1, 0.0 }
 0x186   :  { %432 = vpow2.f32 %v248_v45  ;;  %v268_v4 = vmax.f32 %v260_v54, 0.0  ;;  %v237_v44 = vsel %vm181_vm12, %v229_v25, 0.0 }
 0x187   :  { %v274_v5 = vmul.f32 %v266_v56, %v266_v56  ;;  %v235_v17 = vsel %vm179_vm9, %v227_v13, 0.0 }
 0x188   :  { %v276_v14 = vmul.f32 %v268_v4, %v268_v4 }
 0x18a   :  { %v656_v47 = vpop.xlane.xlu2 %207 }
 0x18b   :  { %v250_v50 = vmul.f32 1.442695, %v656_v47  ;;  %v431_v32 = vpop.eup %430  ;;  %v222_v28 = vsub.f32 0.0, %v656_v47 }
 0x18c   :  { %v259_v57 = vsub.f32 1.0, %v431_v32  ;;  %v433_v58 = vpop.eup %432 }
 0x18d   :  { %434 = vpow2.f32 %v250_v50  ;;  %v261_v7 = vsub.f32 1.0, %v433_v58  ;;  %v230_v43 = vmax.f32 %v222_v28, 0.0 }
 0x18e   :  { %v267_v6 = vmax.f32 %v259_v57, 0.0 }
 0x18f   :  { %v659_v53 = vpop.xlane.xlu0 %210  ;;  %v269_v22 = vmax.f32 %v261_v7, 0.0 }
 0x190   :  { %v252_v34 = vmul.f32 1.442695, %v659_v53  ;;  %v275_v16 = vmul.f32 %v267_v6, %v267_v6  ;;  %v223_v27 = vsub.f32 0.0, %v659_v53 }
 0x191   :  { %v277_v39 = vmul.f32 %v269_v22, %v269_v22 }
 0x192   :  { %436 = vpow2.f32 %v252_v34  ;;  %v662_v55 = vpop.xlane.xlu2 %216  ;;  %v231_v47 = vmax.f32 %v223_v27, 0.0 }
 0x193   :  { %v256_v3 = vmul.f32 1.442695, %v662_v55  ;;  %v435_v40 = vpop.eup %434 }
 0x194   :  { %v664_v60 = vpop.xlane.xlu1 %213  ;;  %v262_v9 = vsub.f32 1.0, %v435_v40 }
 0x195   :  { %v254_v2 = vmul.f32 1.442695, %v664_v60  ;;  %v224_v51 = vsub.f32 0.0, %v664_v60 }
 0x196   :  { %v270_v26 = vmax.f32 %v262_v9, 0.0 }
 0x197   :  { %438 = vpow2.f32 %v254_v2  ;;  %v296_v10 = vpop.xlane.xlu0 %295  ;;  %v238_v2 = vsel %vm182_vm14, %v230_v43, 0.0  ;;  %v232_v4 = vmax.f32 %v224_v51, 0.0 }
 0x198   :  { %v437_v11 = vpop.eup %436  ;;  %v318_v48 = vmul.f32 %v296_v10, %v274_v5  ;;  %440 = vpow2.f32 %v256_v3  ;;  %v278_v53 = vmul.f32 %v270_v26, %v270_v26  ;;  %v225_v3 = vsub.f32 0.0, %v662_v55 }
 0x199   :  { %v263_v46 = vsub.f32 1.0, %v437_v11  ;;  %v239_v5 = vsel %vm183_vm15, %v231_v47, 0.0  ;;  %v240_v19 = vsel %vm184_vm0, %v232_v4, 0.0 }
 0x19a   :  { %v302_v15 = vpop.xlane.xlu2 %301  ;;  %v326_v23 = vmul.f32 %v318_v48, %v234_v29  ;;  %v233_v13 = vmax.f32 %v225_v3, 0.0 }
 0x19b   :  { %v320_v30 = vmul.f32 %v302_v15, %v276_v14  ;;  %v271_v36 = vmax.f32 %v263_v46, 0.0 }
 0x19c   :  { %v299_v18 = vpop.xlane.xlu1 %298  ;;  %v335_v20 = vsel %vm334_vm13, %v326_v23, 0.0  ;;  %v241_v22 = vsel %vm185_vm1, %v233_v13, 0.0 }
 0x19d   :  { %v439_v24 = vpop.eup %438  ;;  %v319_v33 = vmul.f32 %v299_v18, %v275_v16  ;;  %v328_v37 = vmul.f32 %v320_v30, %v236_v35  ;;  %v279_v32 = vmul.f32 %v271_v36, %v271_v36 }
 0x19e   :  { %v264_v41 = vsub.f32 1.0, %v439_v24  ;;  %v441_v42 = vpop.eup %440 }
 0x19f   :  { %v327_v38 = vmul.f32 %v319_v33, %v235_v17  ;;  %v305_v45 = vpop.xlane.xlu0 %304  ;;  %v338_v34 = vsel %vm334_vm13, %v328_v37, 0.0  ;;  %v265_v58 = vsub.f32 1.0, %v441_v42 }
 0x1a0   :  { %v321_v50 = vmul.f32 %v305_v45, %v277_v39  ;;  %v272_v57 = vmax.f32 %v264_v41, 0.0 }
 0x1a1   :  { %v336_v49 = vsel %vm334_vm13, %v327_v38, 0.0  ;;  %v273_v31 = vmax.f32 %v265_v58, 0.0 }
 0x1a2   :  { %v337_v52 = vadd.f32 %v336_v49, %v335_v20  ;;  %v329_v54 = vmul.f32 %v321_v50, %v237_v44  ;;  %v311_v56 = vpop.xlane.xlu2 %310  ;;  %v280_v8 = vmul.f32 %v272_v57, %v272_v57 }
 0x1a3   :  { %v323_v59 = vmul.f32 %v311_v56, %v279_v32  ;;  %v281_v62 = vmul.f32 %v273_v31, %v273_v31 }
 0x1a4   :  { %v339_v21 = vadd.f32 %v338_v34, %v337_v52  ;;  %v308_v61 = vpop.xlane.xlu1 %307  ;;  %v340_v1 = vsel %vm334_vm13, %v329_v54, 0.0 }
 0x1a5   :  { %v322_v60 = vmul.f32 %v308_v61, %v278_v53  ;;  %v331_v6 = vmul.f32 %v323_v59, %v239_v5 }
 0x1a6   :  { %v341_v40 = vadd.f32 %v340_v1, %v339_v21 }
 0x1a7   :  { %v330_v7 = vmul.f32 %v322_v60, %v238_v2  ;;  %v314_v10 = vpop.xlane.xlu0 %313  ;;  %v344_v55 = vsel %vm334_vm13, %v331_v6, 0.0 }
 0x1a8   :  { %v324_v12 = vmul.f32 %v314_v10, %v280_v8 }
 0x1a9   :  { %v342_v11 = vsel %vm334_vm13, %v330_v7, 0.0 }
 0x1aa   :  { %v343_v48 = vadd.f32 %v342_v11, %v341_v40  ;;  %v332_v14 = vmul.f32 %v324_v12, %v240_v19 }
 0x1ac   :  { %v317_v46 = vpop.xlane.xlu1 %316  ;;  %v345_v9 = vadd.f32 %v344_v55, %v343_v48  ;;  %v346_v16 = vsel %vm334_vm13, %v332_v14, 0.0 }
 0x1ad   :  { %v325_v15 = vmul.f32 %v317_v46, %v281_v62 }
 0x1ae   :  { %v347_v25 = vadd.f32 %v346_v16, %v345_v9 }
 0x1af   :  { %v333_v28 = vmul.f32 %v325_v15, %v241_v22 }
 0x1b1   :  { %v348_v29 = vsel %vm334_vm13, %v333_v28, 0.0 }
 0x1b2   :  { %v349_v30 = vadd.f32 %v348_v29, %v347_v25 }
 0x1b4   :  { %350 = vadd.xlane.f32.xlu2 %v349_v30 }
 0x227   :  { %v351_v63 = vpop.xlane.xlu2 %350 }
 0x228   :  { %v352_v18 = vrot.slane %v351_v63, 4 }
 0x22a   :  { %v353_v24 = vadd.f32 %v352_v18, %v351_v63 }
 0x22c   :  { %v354_v0 = vrot.slane %v353_v24, 2 }
 0x22e   :  { %v355_v27 = vadd.f32 %v354_v0, %v353_v24 }
 0x230   :  { %v356_v23 = vrot.slane %v355_v27, 1 }
 0x232   :  { %v357_v33 = vadd.f32 %v356_v23, %v355_v27 }
 0x234   :  { %385 = vpush %v357_v33 }
 0x265   :  { %s386_s21 = spop %385 }
 0x266   :  { %v359_v35 = vstv %s386_s21 }
 0x267   :  { %360 = vst [vmem:[#allocation2] sm:$0xff] %v359_v35 }
 0x268   :  { %371 = dma.vmem_to_hbm [thread:$0]  %s367_s17, 128, %s369_s20, [#allocation3]  }
 0x269   :  { %466 = dma.done.wait [#allocation3], 128  }
 0x26a   :  { %467 = vsyncadd [#allocation3], 4294967168 }
 0x26b   :  { %376 = vsyncpa [#allocation3], 1 }

</bundles_post_ra>
